<compile_context>
chip_gen: v6e
topology: v6e:2x2x1
jax: 0.10.0
libtpu: 0.0.40
codegen_flags: <defaults>
</compile_context>

<pallas_src>
import jax
import jax.numpy as jnp
import numpy as np
from jax import lax
from jax.experimental import pallas as pl
from jax.experimental.pallas import tpu as pltpu

# dot_general dimension_numbers: contract the LAST dim of both operands
# (i.e. a @ b.T without materializing the transpose).
_DN_LAST = (((1,), (1,)), ((), ()))
# contract the FIRST dim of both operands (i.e. a.T @ b without a transpose).
_DN_FIRST = (((0,), (0,)), ((), ()))


def caff_kernel(x0_ref, x1_ref, x0t_ref, x1t_ref,
                w0_ref, b0_ref, w1_ref, b1_ref, m_ref, out_ref):
    f32 = jnp.float32

    # ---- Full-batch projections (cross-attention needs every row) ----------
    # p_i = x_i @ W_i^T + b_i, via contracted-last-dim dot_general (no .T).
    p0 = lax.dot_general(x0_ref[...], w0_ref[...], _DN_LAST,
                         preferred_element_type=f32) + b0_ref[...]        # (B, H)
    p1 = lax.dot_general(x1_ref[...], w1_ref[...], _DN_LAST,
                         preferred_element_type=f32) + b1_ref[...]        # (B, H)

    # ---- This grid step's row tile of each projection -----------------------
    p0_t = lax.dot_general(x0t_ref[...], w0_ref[...], _DN_LAST,
                           preferred_element_type=f32) + b0_ref[...]      # (TB, H)
    p1_t = lax.dot_general(x1t_ref[...], w1_ref[...], _DN_LAST,
                           preferred_element_type=f32) + b1_ref[...]      # (TB, H)

    # ---- Cross-correlation slices for this tile (no transposes) ------------
    pm   = jnp.dot(p0,   m_ref[...], preferred_element_type=f32)          # (B, H)
    pm_t = jnp.dot(p0_t, m_ref[...], preferred_element_type=f32)          # (TB, H)

    # cc_rows[t, b] = (p0_tile[t] @ M) . p1[b]   -> rows of cc for this tile
    # cc_cols[a, t] = (p0[a]      @ M) . p1_t[t] -> cols of cc for this tile
    cc_rows = lax.dot_general(pm_t, p1,   _DN_LAST,
                              preferred_element_type=f32)                 # (TB, B)
    cc_cols = lax.dot_general(pm,   p1_t, _DN_LAST,
                              preferred_element_type=f32)                 # (B, TB)

    # ---- LOG-softmax (matches nn.LogSoftmax in the reference module) -------
    def log_softmax(s, axis):
        m = jnp.max(s, axis=axis, keepdims=True)
        z = s - m
        return z - jnp.log(jnp.sum(jnp.exp(z), axis=axis, keepdims=True))

    w_a   = log_softmax(cc_rows, axis=-1)   # (TB, B)  = log_softmax(cc, -1)[tile]
    w_b_c = log_softmax(cc_cols, axis=0)    # (B, TB)  = log_softmax(cc.T, -1)[tile].T (never transposed)

    # ---- Attention + residual + tanh ----------------------------------------
    att0 = jnp.dot(w_a, p0, preferred_element_type=f32)                   # (TB, H)
    # att1[t, :] = sum_a w_b_c[a, t] * p1[a, :]  -> contract axis 0 with axis 0
    att1 = lax.dot_general(w_b_c, p1, _DN_FIRST,
                           preferred_element_type=f32)                    # (TB, H)

    r0 = jnp.tanh(p0_t + att0)
    r1 = jnp.tanh(p1_t + att1)

    # Single lane-dense store of the whole (TB, 2H) output block.
    out_ref[...] = jnp.concatenate([r0, r1], axis=-1).astype(out_ref.dtype)


def caff_forward(x0, x1, params, *, block_b=None):
    """params: dict with W0 (H,D0), b0 (H,), W1 (H,D1), b1 (H,), M (H,H)."""
    B, D0 = x0.shape
    _, D1 = x1.shape
    H = params["M"].shape[0]

    if block_b is None:
        # Biggest sublane-aligned row tile (<=512) that evenly divides B.
        block_b = B
        for cand in (512, 256, 128, 64, 32, 16, 8):
            if B % cand == 0:
                block_b = cand
                break
    block_b = min(block_b, B)
    assert B % block_b == 0, "block_b must divide B"
    grid = (B // block_b,)

    b0 = params["b0"].reshape(1, H)
    b1 = params["b1"].reshape(1, H)

    in_specs = [
        pl.BlockSpec((B, D0),       lambda i: (0, 0)),   # x0 (full batch view)
        pl.BlockSpec((B, D1),       lambda i: (0, 0)),   # x1 (full batch view)
        pl.BlockSpec((block_b, D0), lambda i: (i, 0)),   # x0 (this tile's rows)
        pl.BlockSpec((block_b, D1), lambda i: (i, 0)),   # x1 (this tile's rows)
        pl.BlockSpec((H, D0),       lambda i: (0, 0)),   # W0 (native layout, no transpose)
        pl.BlockSpec((1, H),        lambda i: (0, 0)),   # b0
        pl.BlockSpec((H, D1),       lambda i: (0, 0)),   # W1
        pl.BlockSpec((1, H),        lambda i: (0, 0)),   # b1
        pl.BlockSpec((H, H),        lambda i: (0, 0)),   # M
    ]
    out_specs = pl.BlockSpec((block_b, 2 * H), lambda i: (i, 0))

    return pl.pallas_call(
        caff_kernel,
        out_shape=jax.ShapeDtypeStruct((B, 2 * H), jnp.float32),
        grid=grid,
        in_specs=in_specs,
        out_specs=out_specs,
        compiler_params=pltpu.CompilerParams(
            dimension_semantics=("parallel",)),   # shards across the 2 TCs on v7x
    )(x0, x1, x0, x1, params["W0"], b0, params["W1"], b1, params["M"])


def caff_reference(x0, x1, params):
    """Pure-JAX reference mirroring the PyTorch forward (eval mode)."""
    p0 = x0 @ params["W0"].T + params["b0"]
    p1 = x1 @ params["W1"].T + params["b1"]
    cc = (p0 @ params["M"]) @ p1.T
    w_a = jax.nn.log_softmax(cc, axis=-1)
    w_b = jax.nn.log_softmax(cc.T, axis=-1)
    r0 = jnp.tanh(p0 + w_a @ p0)
    r1 = jnp.tanh(p1 + w_b @ p1)
    return jnp.concatenate([r0, r1], axis=-1)


if __name__ == "__main__":
    B, D0, D1, H = 16, 16, 24, 32   # small; block_b=8 -> grid=(2,) exercises the parallel axis

    key = jax.random.PRNGKey(0)
    k_x0, k_x1, k_w0, k_b0, k_w1, k_b1, k_m = jax.random.split(key, 7)

    x0 = jax.random.normal(k_x0, (B, D0), dtype=jnp.float32)
    x1 = jax.random.normal(k_x1, (B, D1), dtype=jnp.float32)

    params = {
        "W0": jax.random.normal(k_w0, (H, D0), dtype=jnp.float32) * (1.0 / np.sqrt(D0)),
        "b0": jax.random.normal(k_b0, (H,), dtype=jnp.float32) * 0.01,
        "W1": jax.random.normal(k_w1, (H, D1), dtype=jnp.float32) * (1.0 / np.sqrt(D1)),
        "b1": jax.random.normal(k_b1, (H,), dtype=jnp.float32) * 0.01,
        "M": jax.random.normal(k_m, (H, H), dtype=jnp.float32),
    }

    out = jax.block_until_ready(caff_forward(x0, x1, params, block_b=8))
    ref = jax.block_until_ready(caff_reference(x0, x1, params))
    np.testing.assert_allclose(np.asarray(out), np.asarray(ref), rtol=1e-4, atol=1e-4)

    print("KERNEL_OK")
</pallas_src>

<mosaic_0001>
module attributes {stable_mosaic.version = 11 : i64} {
  func.func @caff_kernel(%arg0: i32, %arg1: memref<16x16xf32, #tpu.memory_space<vmem>>, %arg2: memref<16x24xf32, #tpu.memory_space<vmem>>, %arg3: memref<8x16xf32, #tpu.memory_space<vmem>>, %arg4: memref<8x24xf32, #tpu.memory_space<vmem>>, %arg5: memref<32x16xf32, #tpu.memory_space<vmem>>, %arg6: memref<1x32xf32, #tpu.memory_space<vmem>>, %arg7: memref<32x24xf32, #tpu.memory_space<vmem>>, %arg8: memref<1x32xf32, #tpu.memory_space<vmem>>, %arg9: memref<32x32xf32, #tpu.memory_space<vmem>>, %arg10: memref<8x64xf32, #tpu.memory_space<vmem>>) attributes {dimension_semantics = [#tpu.dimension_semantics<parallel>], iteration_bounds = array<i64: 2>, scalar_prefetch = 0 : i64, scratch_operands = 0 : i64, tpu.core_type = #tpu.core_type<tc>, window_params = [{pipeline_mode = #tpu.pipeline_mode<synchronous>, transform_indices = @transform_0, window_bounds = array<i64: 16, 16>}, {pipeline_mode = #tpu.pipeline_mode<synchronous>, transform_indices = @transform_1, window_bounds = array<i64: 16, 24>}, {transform_indices = @transform_2, window_bounds = array<i64: 8, 16>}, {transform_indices = @transform_3, window_bounds = array<i64: 8, 24>}, {pipeline_mode = #tpu.pipeline_mode<synchronous>, transform_indices = @transform_4, window_bounds = array<i64: 32, 16>}, {pipeline_mode = #tpu.pipeline_mode<synchronous>, transform_indices = @transform_5, window_bounds = array<i64: 1, 32>}, {pipeline_mode = #tpu.pipeline_mode<synchronous>, transform_indices = @transform_6, window_bounds = array<i64: 32, 24>}, {pipeline_mode = #tpu.pipeline_mode<synchronous>, transform_indices = @transform_7, window_bounds = array<i64: 1, 32>}, {pipeline_mode = #tpu.pipeline_mode<synchronous>, transform_indices = @transform_8, window_bounds = array<i64: 32, 32>}, {transform_indices = @transform_9, window_bounds = array<i64: 8, 64>}]} {
    %c0 = arith.constant 0 : index
    %c0_0 = arith.constant 0 : index
    %0 = vector.load %arg1[%c0, %c0_0] : memref<16x16xf32, #tpu.memory_space<vmem>>, vector<16x16xf32>
    %c0_1 = arith.constant 0 : index
    %c0_2 = arith.constant 0 : index
    %1 = vector.load %arg5[%c0_1, %c0_2] : memref<32x16xf32, #tpu.memory_space<vmem>>, vector<32x16xf32>
    %cst = arith.constant dense<0.000000e+00> : vector<16x32xf32>
    %2 = tpu.matmul %0, %1, %cst {dimension_numbers = #tpu.dot_dimension_numbers<[1], [1], [0], [0], [0, 0, 1, 0], [], []>} : vector<16x16xf32>, vector<32x16xf32>, vector<16x32xf32> -> vector<16x32xf32>
    %c0_3 = arith.constant 0 : index
    %c0_4 = arith.constant 0 : index
    %3 = vector.load %arg6[%c0_3, %c0_4] : memref<1x32xf32, #tpu.memory_space<vmem>>, vector<1x32xf32>
    %4 = vector.broadcast %3 : vector<1x32xf32> to vector<16x32xf32>
    %5 = arith.addf %2, %4 : vector<16x32xf32>
    %c0_5 = arith.constant 0 : index
    %c0_6 = arith.constant 0 : index
    %6 = vector.load %arg2[%c0_5, %c0_6] : memref<16x24xf32, #tpu.memory_space<vmem>>, vector<16x24xf32>
    %c0_7 = arith.constant 0 : index
    %c0_8 = arith.constant 0 : index
    %7 = vector.load %arg7[%c0_7, %c0_8] : memref<32x24xf32, #tpu.memory_space<vmem>>, vector<32x24xf32>
    %cst_9 = arith.constant dense<0.000000e+00> : vector<16x32xf32>
    %8 = tpu.matmul %6, %7, %cst_9 {dimension_numbers = #tpu.dot_dimension_numbers<[1], [1], [0], [0], [0, 0, 1, 0], [], []>} : vector<16x24xf32>, vector<32x24xf32>, vector<16x32xf32> -> vector<16x32xf32>
    %c0_10 = arith.constant 0 : index
    %c0_11 = arith.constant 0 : index
    %9 = vector.load %arg8[%c0_10, %c0_11] : memref<1x32xf32, #tpu.memory_space<vmem>>, vector<1x32xf32>
    %10 = vector.broadcast %9 : vector<1x32xf32> to vector<16x32xf32>
    %11 = arith.addf %8, %10 : vector<16x32xf32>
    %c0_12 = arith.constant 0 : index
    %c0_13 = arith.constant 0 : index
    %12 = vector.load %arg3[%c0_12, %c0_13] : memref<8x16xf32, #tpu.memory_space<vmem>>, vector<8x16xf32>
    %c0_14 = arith.constant 0 : index
    %c0_15 = arith.constant 0 : index
    %13 = vector.load %arg5[%c0_14, %c0_15] : memref<32x16xf32, #tpu.memory_space<vmem>>, vector<32x16xf32>
    %cst_16 = arith.constant dense<0.000000e+00> : vector<8x32xf32>
    %14 = tpu.matmul %12, %13, %cst_16 {dimension_numbers = #tpu.dot_dimension_numbers<[1], [1], [0], [0], [0, 0, 1, 0], [], []>} : vector<8x16xf32>, vector<32x16xf32>, vector<8x32xf32> -> vector<8x32xf32>
    %c0_17 = arith.constant 0 : index
    %c0_18 = arith.constant 0 : index
    %15 = vector.load %arg6[%c0_17, %c0_18] : memref<1x32xf32, #tpu.memory_space<vmem>>, vector<1x32xf32>
    %16 = vector.broadcast %15 : vector<1x32xf32> to vector<8x32xf32>
    %17 = arith.addf %14, %16 : vector<8x32xf32>
    %c0_19 = arith.constant 0 : index
    %c0_20 = arith.constant 0 : index
    %18 = vector.load %arg4[%c0_19, %c0_20] : memref<8x24xf32, #tpu.memory_space<vmem>>, vector<8x24xf32>
    %c0_21 = arith.constant 0 : index
    %c0_22 = arith.constant 0 : index
    %19 = vector.load %arg7[%c0_21, %c0_22] : memref<32x24xf32, #tpu.memory_space<vmem>>, vector<32x24xf32>
    %cst_23 = arith.constant dense<0.000000e+00> : vector<8x32xf32>
    %20 = tpu.matmul %18, %19, %cst_23 {dimension_numbers = #tpu.dot_dimension_numbers<[1], [1], [0], [0], [0, 0, 1, 0], [], []>} : vector<8x24xf32>, vector<32x24xf32>, vector<8x32xf32> -> vector<8x32xf32>
    %c0_24 = arith.constant 0 : index
    %c0_25 = arith.constant 0 : index
    %21 = vector.load %arg8[%c0_24, %c0_25] : memref<1x32xf32, #tpu.memory_space<vmem>>, vector<1x32xf32>
    %22 = vector.broadcast %21 : vector<1x32xf32> to vector<8x32xf32>
    %23 = arith.addf %20, %22 : vector<8x32xf32>
    %c0_26 = arith.constant 0 : index
    %c0_27 = arith.constant 0 : index
    %24 = vector.load %arg9[%c0_26, %c0_27] : memref<32x32xf32, #tpu.memory_space<vmem>>, vector<32x32xf32>
    %cst_28 = arith.constant dense<0.000000e+00> : vector<16x32xf32>
    %25 = tpu.matmul %5, %24, %cst_28 {dimension_numbers = #tpu.dot_dimension_numbers<[1], [0], [0], [1], [0, 0, 1, 1], [], []>} : vector<16x32xf32>, vector<32x32xf32>, vector<16x32xf32> -> vector<16x32xf32>
    %c0_29 = arith.constant 0 : index
    %c0_30 = arith.constant 0 : index
    %26 = vector.load %arg9[%c0_29, %c0_30] : memref<32x32xf32, #tpu.memory_space<vmem>>, vector<32x32xf32>
    %cst_31 = arith.constant dense<0.000000e+00> : vector<8x32xf32>
    %27 = tpu.matmul %17, %26, %cst_31 {dimension_numbers = #tpu.dot_dimension_numbers<[1], [0], [0], [1], [0, 0, 1, 1], [], []>} : vector<8x32xf32>, vector<32x32xf32>, vector<8x32xf32> -> vector<8x32xf32>
    %cst_32 = arith.constant dense<0.000000e+00> : vector<8x16xf32>
    %28 = tpu.matmul %27, %11, %cst_32 {dimension_numbers = #tpu.dot_dimension_numbers<[1], [1], [0], [0], [0, 0, 1, 0], [], []>} : vector<8x32xf32>, vector<16x32xf32>, vector<8x16xf32> -> vector<8x16xf32>
    %cst_33 = arith.constant dense<0.000000e+00> : vector<16x8xf32>
    %29 = tpu.matmul %25, %23, %cst_33 {dimension_numbers = #tpu.dot_dimension_numbers<[1], [1], [0], [0], [0, 0, 1, 0], [], []>} : vector<16x32xf32>, vector<8x32xf32>, vector<16x8xf32> -> vector<16x8xf32>
    %cst_34 = arith.constant dense<0xFF800000> : vector<8xf32>
    %30 = vector.multi_reduction <maximumf>, %28, %cst_34 [1] : vector<8x16xf32> to vector<8xf32>
    %31 = vector.shape_cast %30 : vector<8xf32> to vector<8x1xf32>
    %32 = vector.broadcast %31 : vector<8x1xf32> to vector<8x16xf32>
    %33 = arith.subf %28, %32 : vector<8x16xf32>
    %34 = math.exp %33 : vector<8x16xf32>
    %cst_35 = arith.constant dense<0.000000e+00> : vector<8xf32>
    %35 = vector.multi_reduction <add>, %34, %cst_35 [1] : vector<8x16xf32> to vector<8xf32>
    %36 = vector.shape_cast %35 : vector<8xf32> to vector<8x1xf32>
    %37 = math.log %36 : vector<8x1xf32>
    %38 = vector.broadcast %37 : vector<8x1xf32> to vector<8x16xf32>
    %39 = arith.subf %33, %38 : vector<8x16xf32>
    %cst_36 = arith.constant dense<0xFF800000> : vector<8xf32>
    %40 = vector.multi_reduction <maximumf>, %29, %cst_36 [0] : vector<16x8xf32> to vector<8xf32>
    %41 = vector.shape_cast %40 : vector<8xf32> to vector<1x8xf32>
    %42 = vector.broadcast %41 : vector<1x8xf32> to vector<16x8xf32>
    %43 = arith.subf %29, %42 : vector<16x8xf32>
    %44 = math.exp %43 : vector<16x8xf32>
    %cst_37 = arith.constant dense<0.000000e+00> : vector<8xf32>
    %45 = vector.multi_reduction <add>, %44, %cst_37 [0] : vector<16x8xf32> to vector<8xf32>
    %46 = vector.shape_cast %45 : vector<8xf32> to vector<1x8xf32>
    %47 = math.log %46 : vector<1x8xf32>
    %48 = vector.broadcast %47 : vector<1x8xf32> to vector<16x8xf32>
    %49 = arith.subf %43, %48 : vector<16x8xf32>
    %cst_38 = arith.constant dense<0.000000e+00> : vector<8x32xf32>
    %50 = tpu.matmul %39, %5, %cst_38 {dimension_numbers = #tpu.dot_dimension_numbers<[1], [0], [0], [1], [0, 0, 1, 1], [], []>} : vector<8x16xf32>, vector<16x32xf32>, vector<8x32xf32> -> vector<8x32xf32>
    %cst_39 = arith.constant dense<0.000000e+00> : vector<8x32xf32>
    %51 = tpu.matmul %49, %11, %cst_39 {dimension_numbers = #tpu.dot_dimension_numbers<[0], [0], [1], [1], [0, 1, 1, 1], [], []>} : vector<16x8xf32>, vector<16x32xf32>, vector<8x32xf32> -> vector<8x32xf32>
    %52 = arith.addf %17, %50 : vector<8x32xf32>
    %53 = math.tanh %52 : vector<8x32xf32>
    %54 = arith.addf %23, %51 : vector<8x32xf32>
    %55 = math.tanh %54 : vector<8x32xf32>
    %56 = tpu.concatenate %53, %55 in 1 : vector<8x32xf32>, vector<8x32xf32> -> vector<8x64xf32>
    %c0_40 = arith.constant 0 : index
    %c0_41 = arith.constant 0 : index
    %57 = vector.load %arg10[%c0_40, %c0_41] : memref<8x64xf32, #tpu.memory_space<vmem>>, vector<8x64xf32>
    tpu.vector_store %arg10[%c0_40, %c0_41], %56 {strides = array<i32>} : memref<8x64xf32, #tpu.memory_space<vmem>>, vector<8x64xf32>,
    return
  }
  func.func @transform_0(%arg0: i32) -> (i32, i32) {
    %c0_i32 = arith.constant 0 : i32
    %c0_i32_0 = arith.constant 0 : i32
    %c0_i32_1 = arith.constant 0 : i32
    return %c0_i32, %c0_i32_0 : i32, i32
  }
  func.func @transform_1(%arg0: i32) -> (i32, i32) {
    %c0_i32 = arith.constant 0 : i32
    %c0_i32_0 = arith.constant 0 : i32
    %c0_i32_1 = arith.constant 0 : i32
    return %c0_i32, %c0_i32_0 : i32, i32
  }
  func.func @transform_2(%arg0: i32) -> (i32, i32) {
    %c0_i32 = arith.constant 0 : i32
    %c0_i32_0 = arith.constant 0 : i32
    return %arg0, %c0_i32 : i32, i32
  }
  func.func @transform_3(%arg0: i32) -> (i32, i32) {
    %c0_i32 = arith.constant 0 : i32
    %c0_i32_0 = arith.constant 0 : i32
    return %arg0, %c0_i32 : i32, i32
  }
  func.func @transform_4(%arg0: i32) -> (i32, i32) {
    %c0_i32 = arith.constant 0 : i32
    %c0_i32_0 = arith.constant 0 : i32
    %c0_i32_1 = arith.constant 0 : i32
    return %c0_i32, %c0_i32_0 : i32, i32
  }
  func.func @transform_5(%arg0: i32) -> (i32, i32) {
    %c0_i32 = arith.constant 0 : i32
    %c0_i32_0 = arith.constant 0 : i32
    %c0_i32_1 = arith.constant 0 : i32
    return %c0_i32, %c0_i32_0 : i32, i32
  }
  func.func @transform_6(%arg0: i32) -> (i32, i32) {
    %c0_i32 = arith.constant 0 : i32
    %c0_i32_0 = arith.constant 0 : i32
    %c0_i32_1 = arith.constant 0 : i32
    return %c0_i32, %c0_i32_0 : i32, i32
  }
  func.func @transform_7(%arg0: i32) -> (i32, i32) {
    %c0_i32 = arith.constant 0 : i32
    %c0_i32_0 = arith.constant 0 : i32
    %c0_i32_1 = arith.constant 0 : i32
    return %c0_i32, %c0_i32_0 : i32, i32
  }
  func.func @transform_8(%arg0: i32) -> (i32, i32) {
    %c0_i32 = arith.constant 0 : i32
    %c0_i32_0 = arith.constant 0 : i32
    %c0_i32_1 = arith.constant 0 : i32
    return %c0_i32, %c0_i32_0 : i32, i32
  }
  func.func @transform_9(%arg0: i32) -> (i32, i32) {
    %c0_i32 = arith.constant 0 : i32
    %c0_i32_0 = arith.constant 0 : i32
    return %arg0, %c0_i32 : i32, i32
  }
}

</mosaic_0001>

<bundles_post_ra>
// kernel: tpu_custom_call.1
= control target key start
LH: loop header
LB: loop body
LE: loop exit
PB: predicated region body
PF: predicated region fallthrough
CT: control target
= control target key end

     0   :  { %14 = vsyncpa [#allocation3], 0  ;;  %s2073_s0 = inlined_call_operand.vmem [shape: f32[16,16], index: 0, kind: input, shape index: {}]   ;;  %s2074_s1 = inlined_call_operand.vmem [shape: f32[16,24], index: 1, kind: input, shape index: {}]   ;;  %s2075_s2 = inlined_call_operand.vmem [shape: f32[16,16], index: 2, kind: input, shape index: {}]   ;;  %s2076_s3 = inlined_call_operand.hbm [shape: f32[16,24], index: 3, kind: input, shape index: {}]   ;;  %s2077_s4 = inlined_call_operand.vmem [shape: f32[32,16], index: 4, kind: input, shape index: {}]   ;;  %s2078_s5 = inlined_call_operand.vmem [shape: f32[1,32], index: 5, kind: input, shape index: {}]   ;;  %s2079_s6 = inlined_call_operand.vmem [shape: f32[32,24], index: 6, kind: input, shape index: {}]   ;;  %s2080_s7 = inlined_call_operand.vmem [shape: f32[1,32], index: 7, kind: input, shape index: {}]   ;;  %s2081_s8 = inlined_call_operand.vmem [shape: f32[32,32], index: 8, kind: input, shape index: {}]   ;;  %s2082_s9 = inlined_call_operand.hbm [shape: f32[16,64], index: 9, kind: output, shape index: {}]  }
   0x1   :  { %16 = vsyncpa [#allocation3 + $0x1], 0 }
   0x2   :  { %17 = vsyncpa [#allocation4], 0 }
   0x3   :  { %19 = vsyncpa [#allocation4 + $0x1], 0  ;;  %s1772_s30 = smov 0   ;;  %s1774_s10 = smov 0  }
   0x4   :  { %s1776_s11 = smov 0   ;;  %s1778_s12 = smov 0  }
   0x5 LB: > { %2086 = sst [smem:[#allocation8_spill]] %s1711_s11  ;;  %s1793_s13 = sadd.s32 4294967295, %s1715_s12   ;;  %s1715_s12 = sphi %s1778_s12, %s2103_s12   ;;  %s1711_s11 = sphi %s1776_s11, %s2100_s11   ;;  %s1707_s10 = sphi %s1774_s10, %s2102_s10   ;;  %s1703_s30 = sphi %s1772_s30, %s2101_s30  }
   0x6   : > { %s1375_s14 = sadd.s32 4294967294, %s1715_s12   ;;  %s1797_s15 = sadd.s32 1, %s1715_s12  }
   0x7   : > { %s100_s16 = sadd.s32 1, %s1711_s11  ;;  %s97_s17 = ssub.s32 %s1715_s12, %s1797_s15 }
   0x8   : > { %p107_p0 = scmp.ne.s32.totalorder %s1711_s11, %s1707_s10  ;;  %p98_p1 = scmp.eq.s32.totalorder %s97_s17, 0 }
   0x9   : > { %p108_p2 = scmp.eq.s32.totalorder %s1715_s12, 0  ;;  %p113_p3 = scmp.ne.s32.totalorder %s1707_s10, %s1703_s30 }
   0xa   : > { %p114_p4 = scmp.eq.s32.totalorder %s1793_s13, 0  ;;  %p242_p7 = scmp.eq.s32.totalorder %s1793_s13, 1 }
   0xb   : > { %s1809_s18 = scalar_select %p98_p1, %s1711_s11, %s100_s16  }
   0xc   : > { %p1811_p5 = por %p108_p2, %p107_p0  ;;  %p1815_p6 = por %p114_p4, %p113_p3 }
   0xd   : > { %2087 = sst [smem:[#allocation9_spill]] %s1809_s18  ;;  %p248_p8 = scmp.eq.s32.totalorder %s1375_s14, 1 }
   0xe   : > { %s2089_s20 = scalar_select %p1815_p6, 1, 0 }
   0xf   : > { %p1572_p10 = scmp.lt.s32.totalorder %s1715_s12, 2  ;;  %p1822_p11 = por %p242_p7, %p107_p0 }
  0x10   : > { %p1826_p12 = por %p248_p8, %p113_p3  ;;  %s296_s23 = sand.u32 1, %s1711_s11  }
  0x11   : > { %s2090_s21 = scalar_select %p1822_p11, 1, 0 }
  0x12   : > { %s2091_s22 = scalar_select %p1826_p12, 1, 0 }
  0x13   : > { %s1379_s24 = sshll.u32 %s1715_s12, 7  ;;  %s1378_s25 = sshll.u32 %s296_s23, 3 }
  0x14   : > { %s1835_s28 = scalar_lea.hbm %s2076_s3, %s1379_s24  ;;  %s300_s29 = scalar_lea.vmem [#allocation2], %s1378_s25 }
  0x15   : > { %s307_s14 = sshll.u32 %s300_s29, 4  ;;  %p1839_p13 = pnand %p1572_p10, %p1811_p5  ;;  %s1843_s14 = int_to_ptr.vmem [resolvable:$true] %s307_s14 }
  0x16   : > { %s297_s17 = scalar_lea.sflag [#allocation3], %s296_s23  ;;  %s1623_s18 = scalar_lea.hbm %s1835_s28, 128 }
  0x17   : > { %p1624_p2 = scmp.ne.s32.totalorder %s1835_s28, %s1623_s18  ;;  %p1625_p3 = pneg %p1839_p13 }
  0x18   : > { %s1628_s19 = scalar_lea.hbm %s2076_s3, 256  ;;  %p1629_p5 = scmp.lt.s32.totalorder %s1835_s28, %s2076_s3 }
  0x19   : > { %p1626_p4 = pnand %p1625_p3, %p1624_p2  ;;  %p1630_p8 = scmp.lt.s32.totalorder %s1628_s19, %s1623_s18 }
  0x1b   : > { %p1627_p7 = pneg %p1626_p4  ;;  %p1631_p10 = por %p1630_p8, %p1629_p5 }
  0x1d   : > { %p1632_p9 = pnand %p1631_p10, %p1627_p7 }
  0x1f   : > { %1635 = shalt.err (!%p1632_p9)
}
  0x20   : > { %s1636_s23 = scalar_lea.vmem %s1843_s14, 128  ;;  %s1717_s29 = smov [#allocation2]  }
  0x21   : > { %p1637_p0 = scmp.ne.s32.totalorder %s1843_s14, %s1636_s23  ;;  %s1641_s11 = sshll.u32 %s1717_s29, 4  ;;  %s1642_s11 = int_to_ptr.vmem [resolvable:$false] %s1641_s11 }
  0x22   : > { %s1643_s24 = scalar_lea.vmem %s1642_s11, 256  ;;  %p1644_p4 = scmp.lt.s32.totalorder %s1843_s14, %s1642_s11 }
  0x23   : > { %p1639_p1 = pnand %p1637_p0, %p1625_p3  ;;  %p1645_p12 = scmp.lt.s32.totalorder %s1643_s24, %s1636_s23 }
  0x25   : > { %p1640_p2 = pneg %p1639_p1  ;;  %p1646_p11 = por %p1645_p12, %p1644_p4 }
  0x27   : > { %p1647_p6 = pnand %p1646_p11, %p1640_p2 }
  0x29   : > { %1650 = shalt.err (!%p1647_p6)
}
  0x2a   : > { %1567 = dma.hbm_to_vmem [thread:$0]  (!%p1839_p13), %s1835_s28, 128, %s1843_s14, %s297_s17  }
  0x2b   : > { %p2093_p9 = scmp.lt.s32.totalorder %s1715_s12, 3  ;;  %p2094_p7 = scmp.ge.s32.totalorder %s1715_s12, 1 }
  0x2d   : > { %p313_p0 = pnand %p2094_p7, %p2093_p9 }
  0x2e   : > { %s1870_s18 = sand.u32 (!%p313_p0), 1, %s1707_s10   ;;  %p2095_p6 = scmp.ne.s32.totalorder (!%p313_p0), %s2089_s20, 0 }
  0x2f   : > { %316 = sbr.rel (%p313_p0) target bundleno = 1204 (0x4b4), region = 56  ;;  %s1381_s11 = sshll.u32 (!%p313_p0), %s1870_s18, 3 }
  0x30   : > { %s319_s25 = scalar_lea.sflag (!%p313_p0), [#allocation3], %s1870_s18  ;;  %s1876_s16 = scalar_lea.vmem (!%p313_p0), [#allocation2], %s1381_s11 }
  0x34   : > { %1694 = dma.done.wait (%p2095_p6), %s319_s25, 128  }
  0x35   : > { %1696 = vsyncadd (%p2095_p6), %s319_s25, 4294967168  ;;  %vm378_vm0 = vcmask 130048   ;;  %v370_v0 = vld [vmem:[%s2077_s4 + $0x18] sm:$0xff]  ;;  %v369_v1 = vld [vmem:[%s2077_s4 + $0x10] sm:$0xff]  ;;  %vm485_vm1 = vcmask 195584   ;;  %v1718_v11 = vmov 0.0  }
  0x36   : > { %1468 = vmatprep.subr.msk.mxu0 %vm378_vm0, %v370_v0  ;;  %v365_v2 = vld [vmem:[%s2073_s0] sm:$0xff]  ;;  %v477_v3 = vld [vmem:[%s2079_s6 + $0x18] sm:$0xff]  ;;  %v476_v4 = vld [vmem:[%s2079_s6 + $0x10] sm:$0xff]  ;;  %p361_p11 = scmp.lt.s32.totalorder %s1793_s13, 1  ;;  %vm1719_vm2 = vmmov 0   ;;  %vm731_vm3 = vcmask 261120  }
  0x37   : > { %1469 = vmatpush3.xpose.msk.msra.mxu0 %vm378_vm0, %v370_v0  ;;  %1476 = vmatprep.mubr.msk.f32.mxu0 %vm378_vm0, %v365_v2  ;;  %v472_v5 = vld [vmem:[%s2074_s1] sm:$0xff]  ;;  %v368_v6 = vld [vmem:[%s2077_s4 + $0x8] sm:$0xff]  ;;  %v730_v13 = vld [vmem:[%s2081_s8 + $0x18] sm:$0xff]  ;;  %vm1061_vm4 = vcmask 64512   ;;  %s1720_s23 = smov 32   ;;  %s1420_s29 = sshll.u32 %s1793_s13, 7 }
  0x38   : > { %1470 = vmatprep.subr.msk.mxu0 %vm378_vm0, %v369_v1  ;;  %1479 = vmatprep.subr.msk.mxu1 %vm485_vm1, %v477_v3  ;;  %v475_v7 = vld [vmem:[%s2079_s6 + $0x8] sm:$0xff]  ;;  %v367_v8 = vld [vmem:[%s2077_s4] sm:$0xff]  ;;  %s362_s17 = scalar_select %p361_p11, %s1793_s13, 1  ;;  %v729_v15 = vld [vmem:[%s2081_s8 + $0x10] sm:$0xff]  ;;  %vm1277_vm5 = vcmask 523264  }
  0x39   : > { %1480 = vmatpush3.xpose.msk.msra.mxu1 %vm485_vm1, %v477_v3  ;;  %1487 = vmatprep.mubr.msk.f32.mxu1 %vm485_vm1, %v472_v5  ;;  %v474_v9 = vld [vmem:[%s2079_s6] sm:$0xff]  ;;  %v366_v10 = vld [vmem:[%s2073_s0 + $0x8] sm:$0xff]  ;;  %s360_s24 = scalar_lea.vmem [#allocation5], %s1381_s11  ;;  %p2096_p13 = scmp.ne.s32.totalorder %s2090_s21, 0 }
  0x3a   : > { %1481 = vmatprep.subr.msk.mxu1 %vm485_vm1, %v476_v4  ;;  %v473_v12 = vld [vmem:[%s2074_s1 + $0x8] sm:$0xff]  ;;  %s1383_s19 = sshll.u32 %s362_s17, 3  ;;  %v727_v18 = vld [vmem:[%s2081_s8] sm:$0xff]  ;;  %s1293_s25 = sshll.u32 %s360_s24, 4  ;;  %s1294_s25 = int_to_ptr.vmem [resolvable:$true] %s1293_s25 }
  0x3b   : > { %1471 = vmatpush3.xpose.msk.msra.mxu0 %vm378_vm0, %v369_v1  ;;  %s364_s20 = scalar_lea.vmem %s2075_s2, %s1383_s19  ;;  %v653_v16 = vld [vmem:[%s1876_s16] sm:$0xff]  ;;  %s2035_s17 = scalar_lea.hbm %s2082_s9, %s1420_s29 }
  0x3c   : > { %1472 = vmatprep.subr.msk.mxu0 %vm378_vm0, %v368_v6  ;;  %v579_v14 = vld [vmem:[%s364_s20] sm:$0xff]  ;;  %v728_v17 = vld [vmem:[%s2081_s8 + $0x8] sm:$0xff]  ;;  %s1280_s19 = scalar_lea.sflag [#allocation4], %s1870_s18  ;;  %s1651_s16 = scalar_lea.vmem %s1294_s25, 128 }
  0x3d   : > { %1482 = vmatpush3.xpose.msk.msra.mxu1 %vm485_vm1, %v476_v4  ;;  %v1384_v20 = vld [vmem:[%s2078_s5] ss:$0 sm:$0xff]  ;;  %p1652_p12 = scmp.ne.s32.totalorder %s1294_s25, %s1651_s16  ;;  %s1721_s13 = smov [#allocation5]  }
  0x3e   : > { %1483 = vmatprep.subr.msk.mxu1 %vm485_vm1, %v475_v7  ;;  %v1391_v21 = vld [vmem:[%s2080_s7] ss:$0 sm:$0xff]  ;;  %s1655_s11 = sshll.u32 %s1721_s13, 4  ;;  %s1656_s11 = int_to_ptr.vmem [resolvable:$false] %s1655_s11 }
  0x3f   : > { %1473 = vmatpush3.xpose.msk.msra.mxu0 %vm378_vm0, %v368_v6  ;;  %p1653_p1 = pnand %p1652_p12, %p2096_p13  ;;  %s1657_s26 = scalar_lea.vmem %s1656_s11, 256 }
  0x40   : > { %1474 = vmatprep.subr.msk.mxu0 %vm378_vm0, %v367_v8  ;;  %p1658_p5 = scmp.lt.s32.totalorder %s1294_s25, %s1656_s11  ;;  %p1659_p8 = scmp.lt.s32.totalorder %s1657_s26, %s1651_s16 }
  0x41   : > { %1484 = vmatpush3.xpose.msk.msra.mxu1 %vm485_vm1, %v475_v7  ;;  %p1654_p3 = pneg %p1653_p1 }
  0x42   : > { %1485 = vmatprep.subr.msk.mxu1 %vm485_vm1, %v474_v9  ;;  %p1660_p10 = por %p1659_p8, %p1658_p5 }
  0x43   : > { %1475 = vmatpush3.xpose.msk.msra.mxu0 %vm378_vm0, %v367_v8 }
  0x44   : > { %1490 = vmatprep.subr.mxu0 %v1718_v11  ;;  %p1661_p2 = pnand %p1660_p10, %p1654_p3 }
  0x45   : > { %1486 = vmatpush3.xpose.msk.msra.mxu1 %vm485_vm1, %v474_v9 }
  0x46   : > { %1477 = vmatmul.mubr.msk.f32.vlgmr.msra.gmra.mxu0 %vm378_vm0, %v366_v10  ;;  %1501 = vmatprep.subr.mxu1 %v1718_v11 }
  0x47   : > { %1491 = vmatpush3.xpose.msk.msra.mxu0 %vm378_vm0, %v370_v0  ;;  %1498 = vmatprep.mubr.msk.f32.mxu0 %vm1719_vm2, %v1718_v11 }
  0x48   : > { %1492 = vmatprep.subr.mxu0 %v1718_v11  ;;  %1488 = vmatmul.mubr.msk.f32.vlgmr.msra.gmra.mxu1 %vm485_vm1, %v473_v12 }
  0x49   : > { %1502 = vmatpush3.xpose.msk.msra.mxu1 %vm485_vm1, %v477_v3  ;;  %1509 = vmatprep.mubr.msk.f32.mxu1 %vm1719_vm2, %v1718_v11 }
  0x4a   : > { %1503 = vmatprep.subr.mxu1 %v1718_v11 }
  0x4b   : > { %1493 = vmatpush3.xpose.msk.msra.mxu0 %vm378_vm0, %v369_v1 }
  0x4c   : > { %1494 = vmatprep.subr.mxu0 %v1718_v11 }
  0x4d   : > { %1504 = vmatpush3.xpose.msk.msra.mxu1 %vm485_vm1, %v476_v4 }
  0x4e   : > { %1505 = vmatprep.subr.mxu1 %v1718_v11 }
  0x4f   : > { %1495 = vmatpush3.xpose.msk.msra.mxu0 %vm378_vm0, %v368_v6 }
  0x50   : > { %1496 = vmatprep.subr.mxu0 %v1718_v11 }
  0x51   : > { %1506 = vmatpush3.xpose.msk.msra.mxu1 %vm485_vm1, %v475_v7 }
  0x52   : > { %1507 = vmatprep.subr.mxu1 %v1718_v11 }
  0x53   : > { %1497 = vmatpush3.xpose.msk.msra.mxu0 %vm378_vm0, %v367_v8 }
  0x54   : > { %1512 = vmatprep.subr.mxu0 %v730_v13 }
  0x55   : > { %1508 = vmatpush3.xpose.msk.msra.mxu1 %vm485_vm1, %v474_v9 }
  0x56   : > { %1499 = vmatmul.mubr.msk.f32.vlgmr.msra.gmra.mxu0 %vm378_vm0, %v579_v14  ;;  %1523 = vmatprep.subr.mxu1 %v1718_v11 }
  0x57   : > { %1513 = vmatpush3.msra.mxu0 %v730_v13 }
  0x58   : > { %1514 = vmatprep.subr.mxu0 %v729_v15  ;;  %1510 = vmatmul.mubr.msk.f32.vlgmr.msra.gmra.mxu1 %vm485_vm1, %v653_v16 }
  0x59   : > { %1515 = vmatpush3.msra.mxu0 %v729_v15  ;;  %1524 = vmatpush3.msra.mxu1 %v730_v13 }
  0x5a   : > { %1516 = vmatprep.subr.mxu0 %v728_v17  ;;  %1525 = vmatprep.subr.mxu1 %v1718_v11 }
  0x5b   : > { %1517 = vmatpush3.msra.mxu0 %v728_v17  ;;  %1526 = vmatpush3.msra.mxu1 %v729_v15 }
  0x5c   : > { %1518 = vmatprep.subr.mxu0 %v727_v18  ;;  %1527 = vmatprep.subr.mxu1 %v1718_v11 }
  0x5d   : > { %1519 = vmatpush3.msra.mxu0 %v727_v18  ;;  %1531 = vmatprep.mubr.msk.f32.mxu1 %vm1719_vm2, %v1718_v11 }
  0x5e   : > { %1528 = vmatpush3.msra.mxu1 %v728_v17  ;;  %1534 = vmatprep.subr.mxu0 %v1718_v11 }
  0x5f   : > { %1529 = vmatprep.subr.mxu1 %v1718_v11 }
  0x60   : > { %1530 = vmatpush3.msra.mxu1 %v727_v18 }
 0x106   : > { %v1478_v19 = vpop.f32.mrf.mxu0 }
 0x107   : > { %v469_v26 = vadd.f32 %v1478_v19, %v1384_v20 }
 0x108   : > { %v463_v22 = vpop.f32.mrf.mxu0  ;;  %v1489_v23 = vpop.f32.mrf.mxu1 }
 0x109   : > { %v464_v24 = vadd.f32 %v1384_v20, %v463_v22  ;;  %v576_v25 = vadd.f32 %v1489_v23, %v1391_v21 }
 0x10a   : > { %v570_v27 = vpop.f32.mrf.mxu1 }
 0x10b   : > { %1520 = vmatprep.mubr.msk.f32.mxu0 %vm731_vm3, %v464_v24  ;;  %v571_v28 = vadd.f32 %v1391_v21, %v570_v27 }
 0x10c   : > { %1521 = vmatmul.mubr.msk.f32.vlgmr.msra.gmra.mxu0 %vm731_vm3, %v469_v26 }
 0x10d   : > { %1535 = vmatpush3.xpose.msk.msra.mxu0 %vm731_vm3, %v576_v25  ;;  %1538 = vmatprep.mubr.msk.f32.mxu0 %vm1719_vm2, %v1718_v11 }
 0x10e   : > { %1536 = vmatprep.subr.mxu0 %v1718_v11 }
 0x111   : > { %1537 = vmatpush3.xpose.msk.msra.mxu0 %vm731_vm3, %v571_v28 }
 0x112   : > { %1553 = vmatprep.subr.mxu0 %v1718_v11 }
 0x116   : > { %v649_v29 = vpop.f32.mrf.mxu0 }
 0x117   : > { %v1999_v30 = vadd.f32 %v1384_v20, %v649_v29 }
 0x118   : > { %v1500_v31 = vpop.f32.mrf.mxu0  ;;  %v723_v32 = vpop.f32.mrf.mxu1 }
 0x119   : > { %1532 = vmatmul.mubr.msk.f32.vlgmr.msra.gmra.mxu1 %vm731_vm3, %v1999_v30  ;;  %v2003_v33 = vadd.f32 %v1391_v21, %v723_v32 }
 0x11a   : > { %v1511_v34 = vpop.f32.mrf.mxu1 }
 0x11b   : > { %1541 = vmatprep.subr.msk.mxu1 %vm731_vm3, %v2003_v33 }
 0x11c   : > { %1542 = vmatpush3.xpose.msk.msra.mxu1 %vm731_vm3, %v2003_v33 }
 0x11d   : > { %1546 = vmatprep.subr.mxu1 %v1718_v11 }
 0x1cc   : > { %v1522_v35 = vpop.f32.mrf.mxu0 }
 0x1ce   : > { %v804_v36 = vpop.f32.mrf.mxu0 }
 0x1cf   : > { %1543 = vmatprep.mubr.msk.f32.mxu1 %vm731_vm3, %v804_v36 }
 0x1d0   : > { %1544 = vmatmul.mubr.msk.f32.vlgmr.msra.gmra.mxu1 %vm731_vm3, %v1522_v35 }
 0x1d1   : > { %1547 = vmatpush3.msra.mxu1 %v469_v26  ;;  %1550 = vmatprep.mubr.msk.f32.mxu1 %vm1719_vm2, %v1718_v11 }
 0x1d2   : > { %1548 = vmatprep.subr.mxu1 %v1718_v11 }
 0x1d3   : > { %1549 = vmatpush3.msra.mxu1 %v464_v24 }
 0x1d9   : > { %v882_v37 = vpop.f32.mrf.mxu1 }
 0x1da   : > { %1539 = vmatmul.mubr.msk.f32.vlgmr.msra.gmra.mxu0 %vm731_vm3, %v882_v37 }
 0x1db   : > { %1554 = vmatpush3.msra.mxu0 %v576_v25  ;;  %v1533_v38 = vpop.f32.mrf.mxu1  ;;  %1557 = vmatprep.mubr.msk.f32.mxu0 %vm1719_vm2, %v1718_v11 }
 0x1dc   : > { %1555 = vmatprep.subr.mxu0 %v1718_v11 }
 0x1dd   : > { %1556 = vmatpush3.msra.mxu0 %v571_v28 }
 0x290   : > { %v1545_v39 = vpop.f32.mrf.mxu1 }
 0x291   : > { %v1063_v41 = vsel %vm1061_vm4, %v1545_v39, -inf }
 0x292   : > { %v1040_v40 = vpop.f32.mrf.mxu1 }
 0x293   : > { %v1062_v42 = vsel %vm1061_vm4, %v1040_v40, -inf }
 0x294   : > { %v1064_v43 = vmax.f32 %v1062_v42, %v1063_v41 }
 0x296   : > { %v1065_v44 = vrot.slane %v1064_v43, 4 }
 0x298   : > { %v1066_v45 = vmax.f32 %v1064_v43, %v1065_v44 }
 0x29a   : > { %v1067_v46 = vrot.slane %v1066_v45, 2  ;;  %v961_v47 = vpop.f32.mrf.mxu0 }
 0x29b   : > { %v1049_v48 = vsel %vm378_vm0, %v961_v47, -inf }
 0x29c   : > { %v1068_v49 = vmax.f32 %v1066_v45, %v1067_v46  ;;  %1050 = vmax.xlane.f32.xlu0 %v1049_v48  ;;  %v1540_v50 = vpop.f32.mrf.mxu0 }
 0x29e   : > { %v1069_v51 = vrot.slane %v1068_v49, 1 }
 0x2a0   : > { %v1070_v52 = vmax.f32 %v1068_v49, %v1069_v51 }
 0x2a2   : > { %v1071_v53 = vsub.f32 %v1040_v40, %v1070_v52  ;;  %v1072_v54 = vsub.f32 %v1545_v39, %v1070_v52 }
 0x2a4   : > { %v1073_v55 = vmul.f32 1.442695, %v1071_v53  ;;  %v1075_v56 = vmul.f32 1.442695, %v1072_v54 }
 0x2a6   : > { %1609 = vpow2.f32 %v1073_v55 }
 0x2a7   : > { %1611 = vpow2.f32 %v1075_v56 }
 0x2b3   : > { %v1610_v57 = vpop.eup %1609 }
 0x2b4   : > { %v1612_v58 = vpop.eup %1611  ;;  %v1077_v59 = vsel %vm1061_vm4, %v1610_v57, 0.0 }
 0x2b5   : > { %v1078_v60 = vsel %vm1061_vm4, %v1612_v58, 0.0 }
 0x2b6   : > { %v1079_v61 = vadd.f32 %v1078_v60, %v1077_v59 }
 0x2b8   : > { %v1080_v62 = vrot.slane %v1079_v61, 4 }
 0x2ba   : > { %v1081_v63 = vadd.f32 %v1080_v62, %v1079_v61 }
 0x2bc   : > { %v1082_v0 = vrot.slane %v1081_v63, 2 }
 0x2be   : > { %v1083_v1 = vadd.f32 %v1082_v0, %v1081_v63 }
 0x2c0   : > { %v1084_v2 = vrot.slane %v1083_v1, 1 }
 0x2c2   : > { %v1085_v3 = vadd.f32 %v1084_v2, %v1083_v1 }
 0x2c4   : > { %1613 = vlog2.f32 %v1085_v3 }
 0x2d1   : > { %v1614_v4 = vpop.eup %1613 }
 0x2d2   : > { %v1087_v5 = vmul.f32 0.6931472, %v1614_v4 }
 0x2d4   : > { %v1088_v6 = vsub.f32 %v1071_v53, %v1087_v5  ;;  %v1089_v7 = vsub.f32 %v1072_v54, %v1087_v5 }
 0x2d6   : > { %1163 = vxpose.xlu0.b32.start [1/2] (short) (narrow) %v1088_v6, 8 }
 0x2da   : > { %1164 = vxpose.xlu0.b32.end [2/2] (short) (narrow) %v1089_v7, 8 }
 0x325   : > { %v1051_v8 = vpop.xlane.xlu0 %1050 }
 0x326   : > { %v1052_v9 = vsub.f32 %v961_v47, %v1051_v8 }
 0x328   : > { %v1053_v10 = vmul.f32 1.442695, %v1052_v9 }
 0x32a   : > { %1615 = vpow2.f32 %v1053_v10 }
 0x337   : > { %v1616_v11 = vpop.eup %1615 }
 0x338   : > { %v1055_v12 = vsel %vm378_vm0, %v1616_v11, 0.0 }
 0x339   : > { %1056 = vadd.xlane.f32.xlu1 %v1055_v12 }
 0x352   : > { %v1179_v13 = vpop.trf.xlu0 }
 0x353   : > { %1558 = vmatmul.mubr.msk.f32.vlgmr.msra.gmra.mxu0 %vm378_vm0, %v1179_v13 }
 0x3c2   : > { %v1057_v14 = vpop.xlane.xlu1 %1056 }
 0x3c3   : > { %1617 = vlog2.f32 %v1057_v14 }
 0x3d0   : > { %v1618_v15 = vpop.eup %1617 }
 0x3d1   : > { %v1059_v16 = vmul.f32 0.6931472, %v1618_v15 }
 0x3d3   : > { %v1060_v17 = vsub.f32 %v1052_v9, %v1059_v16 }
 0x3d5   : > { %1551 = vmatmul.mubr.msk.f32.vlgmr.msra.gmra.mxu1 %vm378_vm0, %v1060_v17 }
 0x413   : > { %v1264_v18 = vpop.f32.mrf.mxu0 }
 0x414   : > { %v1270_v19 = vadd.f32 %v1264_v18, %v2003_v33 }
 0x415   : > { %v1559_v20 = vpop.f32.mrf.mxu0 }
 0x416   : > { %1619 = vtanh.f32 %v1270_v19 }
 0x423   : > { %v1620_v21 = vpop.eup %1619 }
 0x424   : > { %1273 = vrot.lane.b32.xlu1 %v1620_v21, %s1720_s23 }
 0x495   : > { %v1159_v22 = vpop.f32.mrf.mxu1 }
 0x496   : > { %v1268_v23 = vadd.f32 %v1159_v22, %v1999_v30  ;;  %v1274_v26 = vpop.permute.xlu1 %1273 }
 0x497   : > { %v1552_v24 = vpop.f32.mrf.mxu1 }
 0x498   : > { %1621 = vtanh.f32 %v1268_v23 }
 0x4a5   : > { %v1622_v25 = vpop.eup %1621 }
 0x4a6   : > { %v1276_v27 = vsel %vm731_vm3, %v1622_v25, %v1274_v26 }
 0x4a7   : > { %1278 = vst.msk [vmem:[%s360_s24] sm:$0xff] %vm1277_vm5, %v1276_v27 }
 0x4a8   : > { %1664 = shalt.err (!%p1661_p2)
}
 0x4a9   : > { %s1665_s27 = scalar_lea.hbm %s2035_s17, 128  ;;  %s1669_s23 = scalar_lea.hbm %s2082_s9, 256 }
 0x4aa   : > { %p1666_p4 = scmp.ne.s32.totalorder %s2035_s17, %s1665_s27  ;;  %p1670_p0 = scmp.lt.s32.totalorder %s2035_s17, %s2082_s9 }
 0x4ab   : > { %p1671_p6 = scmp.lt.s32.totalorder %s1669_s23, %s1665_s27 }
 0x4ac   : > { %p1667_p9 = pnand %p1666_p4, %p2096_p13 }
 0x4ad   : > { %p1672_p11 = por %p1671_p6, %p1670_p0 }
 0x4ae   : > { %p1668_p7 = pneg %p1667_p9 }
 0x4b0   : > { %p1673_p12 = pnand %p1672_p11, %p1668_p7 }
 0x4b2   : > { %1676 = shalt.err (!%p1673_p12)
}
 0x4b3   : > { %1562 = dma.vmem_to_hbm [thread:$0]  (%p2096_p13), %s1294_s25, 128, %s2035_s17, %s1280_s19  }
 0x4b4 PF: > { %s1305_s28 = sand.u32 1, %s1703_s30   ;;  %p2097_p1 = scmp.ne.s32.totalorder %s2091_s22, 0 }
 0x4b5   : > { %p2098_p3 = scmp.ge.s32.totalorder %s1715_s12, 2  ;;  %s1306_s14 = scalar_lea.sflag [#allocation4], %s1305_s28 }
 0x4b7   : > { %p1569_p5 = pnand %p2098_p3, %p2097_p1 }
 0x4b9   : > { %p1570_p8 = pneg %p1569_p5 }
 0x4bb   : > { %1698 = dma.done.wait (%p1570_p8), %s1306_s14, 128  }
 0x4bc   : > { %1700 = vsyncadd (%p1570_p8), %s1306_s14, 4294967168  ;;  %s2099_s16 = sld [smem:[#allocation8_spill]]  ;;  %p22_p10 = scmp.ge.s32.totalorder %s1797_s15, 4  }
 0x4bd   : > { %s2100_s11 = sld [smem:[#allocation9_spill]]  ;;  %s2101_s30 = smov %s1707_s10 }
 0x4be   : > { %s2103_s12 = smov %s1797_s15  ;;  %24 = sbr.rel (!%p22_p10) target bundleno = 5 (0x5), region = 104 }
 0x4c2   : > { %s2102_s10 = smov %s2099_s16 }
 0x4c3   :  { %1311 = vsyncpa [#allocation3], 1 }
 0x4c4   :  { %1313 = vsyncpa [#allocation3 + $0x1], 1 }
 0x4c5   :  { %1314 = vsyncpa [#allocation4], 1 }
 0x4c6   :  { %1316 = vsyncpa [#allocation4 + $0x1], 1 }

</bundles_post_ra>
